<compile_context>
chip_gen: v6e
topology: v6e:2x2x1
jax: 0.10.0
libtpu: 0.0.40
codegen_flags: <defaults>
</compile_context>

<pallas_src>
import functools

import jax
import jax.numpy as jnp
from jax.experimental import pallas as pl
from jax.experimental.pallas import tpu as pltpu

_MIB = 1024 * 1024


def _tpu_vmem_bytes():
    """Physical VMEM per TensorCore (falls back to 128 MiB if the query fails)."""
    try:
        return int(pltpu.get_tpu_info().vmem_capacity_bytes)
    except Exception:
        return 128 * _MIB


def _vmem_limit_bytes(vmem=None):
    if vmem is None:
        vmem = _tpu_vmem_bytes()
    # Leave headroom for compiler scratch: ~56 MiB on v7x, 100 MiB on v5e/v6e.
    return int(min(vmem - 8 * _MIB, 100 * _MIB))


def _choose_block_n(n, k, itemsize):
    """Row tile sized for the HBM roofline and a temp-aware VMEM budget."""
    vmem = _tpu_vmem_bytes()
    two_cores = vmem <= 64 * _MIB          # v7x: 64 MiB/TC, 2 TCs; v5e/v6e: 128 MiB, 1 TC
    vmem_limit = _vmem_limit_bytes(vmem)

    # Per-row VMEM cost: 2 inputs x 2 pipeline buffers (input dtype) plus the
    # in-kernel f32 working set (upcasts, exp, nll, t*nll) and the bf16 MXU rhs.
    per_row = 2 * 2 * k * itemsize + 5 * k * 4
    bn_vmem = max((vmem_limit - 2 * _MIB) // per_row, 1)

    # HBM-roofline target: move enough input bytes per grid step that the
    # ~0.35 us per-step overhead stays <10% (>=16 MiB/step on v7x @3.2 TB/s,
    # >=8 MiB/step on v5e/v6e).
    step_target = (16 if two_cores else 8) * _MIB
    bn_target = max(step_target // (2 * k * itemsize), 1)

    bn = min(bn_vmem, bn_target)

    # Keep >=2 grid steps per TensorCore so the "parallel" axis uses both v7x cores.
    min_tiles = 4 if two_cores else 1
    bn = min(bn, pl.cdiv(n, min_tiles))

    # Lane/sublane alignment: 128 rows when the batch allows it (unmasked vst,
    # lane-aligned MXU N dim), else the input dtype's sublane-packing multiple.
    sublane = 8 * max(1, 4 // itemsize)    # 8 for f32, 16 for bf16, 32 for 8-bit
    align = 128 if n >= 128 else sublane
    bn = max((bn // align) * align, align)
    return int(bn)


def _soft_ce_kernel(x_ref, t_ref, w_ref, loss_ref, *, block_n, n_rows, mask_tail):
    """Per-row soft-CE losses of one (block_n, K) tile, written lane-dense (1, block_n)."""
    x = x_ref[...].astype(jnp.float32)      # (TN, K) logits
    t = t_ref[...].astype(jnp.float32)      # (TN, K) soft targets

    if mask_tail:
        # Ragged tail handled in-kernel (no wrapper-side jnp.pad / extra HBM pass):
        # zero out rows past the true batch size so they contribute exactly 0.
        row0 = pl.program_id(0) * block_n
        rows = row0 + jax.lax.broadcasted_iota(jnp.int32, (block_n, 1), 0)
        valid = rows < n_rows
        x = jnp.where(valid, x, 0.0)
        t = jnp.where(valid, t, 0.0)

    # Numerically-stable -log_softmax(x).
    m = jnp.max(x, axis=-1, keepdims=True)                              # (TN, 1)
    lse = jnp.log(jnp.sum(jnp.exp(x - m), axis=-1, keepdims=True)) + m  # (TN, 1)
    nll = lse - x                                                       # (TN, K)

    # Weighted class reduction on the MXU, bf16 operands / f32 accumulation:
    # contract K of (1, K) weights with K of (TN, K) -> lane-dense (1, TN).
    rhs = (t * nll).astype(jnp.bfloat16)
    w = w_ref[...].astype(jnp.bfloat16)
    loss_ref[...] = jax.lax.dot_general(
        w, rhs,
        dimension_numbers=(((1,), (1,)), ((), ())),
        preferred_element_type=jnp.float32)


@functools.partial(jax.jit, static_argnames=("reduction", "block_n"))
def soft_cross_entropy_loss(logits, target, weight=None, reduction="mean", block_n=None):
    n, k = logits.shape
    itemsize = jnp.dtype(logits.dtype).itemsize
    if block_n is None:
        block_n = _choose_block_n(n, k, itemsize)
    num_tiles = pl.cdiv(n, block_n)
    mask_tail = (n % block_n) != 0

    if weight is None:
        w = jnp.ones((1, k), jnp.float32)
    else:
        w = jnp.asarray(weight, jnp.float32).reshape(1, k)

    kernel = functools.partial(
        _soft_ce_kernel, block_n=block_n, n_rows=n, mask_tail=mask_tail)

    # TODO(synk): for vocab-scale K (>=16K classes) add a trailing "arbitrary" K
    # grid axis with an online logsumexp + VMEM accumulator instead of loading
    # the full (block_n, K) row strip (keeps row tiles large within v7x's 64 MiB).
    losses = pl.pallas_call(
        kernel,
        out_shape=jax.ShapeDtypeStruct((num_tiles, block_n), jnp.float32),
        grid=(num_tiles,),
        in_specs=[
            pl.BlockSpec((block_n, k), lambda i: (i, 0)),   # logits tile
            pl.BlockSpec((block_n, k), lambda i: (i, 0)),   # soft-target tile
            pl.BlockSpec((1, k), lambda i: (0, 0)),         # class weights (block reused)
        ],
        out_specs=pl.BlockSpec((1, block_n), lambda i: (i, 0)),
        compiler_params=pltpu.CompilerParams(
            dimension_semantics=("parallel",),              # no cross-step state
            vmem_limit_bytes=_vmem_limit_bytes(),
        ),
    )(logits, target, w)

    if reduction == "none":
        return losses.reshape(num_tiles * block_n)[:n]
    if reduction == "sum":
        return jnp.sum(losses)
    if reduction == "mean":
        # The reference module applies `weight` outside F.cross_entropy, so
        # 'mean' divides by N (plain mean), which we match exactly.
        return jnp.sum(losses) / n
    raise ValueError(f"Unrecognized reduction: {reduction}")


def _reference(logits, target, weight, reduction="mean"):
    # Pure-JAX reference mirroring the PyTorch loop.
    nll = -jax.nn.log_softmax(logits.astype(jnp.float32), axis=-1)
    losses = jnp.sum(target.astype(jnp.float32) * weight[None, :] * nll, axis=-1)
    if reduction == "mean":
        return losses.mean()
    if reduction == "sum":
        return losses.sum()
    return losses


if __name__ == "__main__":
    key = jax.random.PRNGKey(0)
    k1, k2 = jax.random.split(key)

    n, k = 64, 32  # small (N, K) consistent with the module's 2-D logits / soft targets
    logits = jax.random.normal(k1, (n, k), dtype=jnp.float32)
    target = jax.nn.softmax(jax.random.normal(k2, (n, k), dtype=jnp.float32), axis=-1)
    weight = jnp.array([0.5 + 0.05 * i for i in range(k)], dtype=jnp.float32)

    # mean / sum / none against the pure-JAX reference.
    for red in ("mean", "sum", "none"):
        out = soft_cross_entropy_loss(logits, target, weight, reduction=red)
        jax.block_until_ready(out)
        ref = _reference(logits, target, weight, red)
        assert jnp.allclose(out, ref, rtol=1e-2, atol=1e-2), (red, out, ref)

    # weight=None path (module's default).
    out = soft_cross_entropy_loss(logits, target, None, reduction="mean")
    jax.block_until_ready(out)
    ref = _reference(logits, target, jnp.ones((k,), jnp.float32), "mean")
    assert jnp.allclose(out, ref, rtol=1e-2, atol=1e-2), (out, ref)

    # bf16 inputs (exercise the in-kernel upcast + bf16 MXU path).
    out = soft_cross_entropy_loss(logits.astype(jnp.bfloat16),
                                  target.astype(jnp.bfloat16),
                                  weight, reduction="mean")
    jax.block_until_ready(out)
    ref = _reference(logits.astype(jnp.bfloat16), target.astype(jnp.bfloat16),
                     weight, "mean")
    assert jnp.allclose(out, ref, rtol=2e-2, atol=2e-2), (out, ref)

    # Multi-tile grid + in-kernel ragged-tail masking (N not a multiple of block_n).
    n2 = 40
    logits2 = jax.random.normal(k1, (n2, k), dtype=jnp.float32)
    target2 = jax.nn.softmax(jax.random.normal(k2, (n2, k), dtype=jnp.float32), axis=-1)
    for red in ("mean", "none"):
        out = soft_cross_entropy_loss(logits2, target2, weight, reduction=red, block_n=16)
        jax.block_until_ready(out)
        ref = _reference(logits2, target2, weight, red)
        assert jnp.allclose(out, ref, rtol=1e-2, atol=1e-2), red

    print("KERNEL_OK")
</pallas_src>

<mosaic_0001>
module attributes {stable_mosaic.version = 11 : i64} {
  func.func @_soft_ce_kernel(%arg0: i32, %arg1: memref<64x32xf32, #tpu.memory_space<vmem>>, %arg2: memref<64x32xf32, #tpu.memory_space<vmem>>, %arg3: memref<1x32xf32, #tpu.memory_space<vmem>>, %arg4: memref<1x64xf32, #tpu.memory_space<vmem>>) attributes {dimension_semantics = [#tpu.dimension_semantics<parallel>], iteration_bounds = array<i64: 1>, scalar_prefetch = 0 : i64, scratch_operands = 0 : i64, tpu.core_type = #tpu.core_type<tc>, window_params = [{transform_indices = @transform_0, window_bounds = array<i64: 64, 32>}, {transform_indices = @transform_1, window_bounds = array<i64: 64, 32>}, {pipeline_mode = #tpu.pipeline_mode<synchronous>, transform_indices = @transform_2, window_bounds = array<i64: 1, 32>}, {transform_indices = @transform_3, window_bounds = array<i64: 1, 64>}]} {
    %c0 = arith.constant 0 : index
    %c0_0 = arith.constant 0 : index
    %0 = vector.load %arg1[%c0, %c0_0] : memref<64x32xf32, #tpu.memory_space<vmem>>, vector<64x32xf32>
    %c0_1 = arith.constant 0 : index
    %c0_2 = arith.constant 0 : index
    %1 = vector.load %arg2[%c0_1, %c0_2] : memref<64x32xf32, #tpu.memory_space<vmem>>, vector<64x32xf32>
    %cst = arith.constant dense<0xFF800000> : vector<64xf32>
    %2 = vector.multi_reduction <maximumf>, %0, %cst [1] : vector<64x32xf32> to vector<64xf32>
    %3 = vector.shape_cast %2 : vector<64xf32> to vector<64x1xf32>
    %4 = vector.broadcast %3 : vector<64x1xf32> to vector<64x32xf32>
    %5 = arith.subf %0, %4 : vector<64x32xf32>
    %6 = math.exp %5 : vector<64x32xf32>
    %cst_3 = arith.constant dense<0.000000e+00> : vector<64xf32>
    %7 = vector.multi_reduction <add>, %6, %cst_3 [1] : vector<64x32xf32> to vector<64xf32>
    %8 = vector.shape_cast %7 : vector<64xf32> to vector<64x1xf32>
    %9 = math.log %8 : vector<64x1xf32>
    %10 = arith.addf %9, %3 : vector<64x1xf32>
    %11 = vector.broadcast %10 : vector<64x1xf32> to vector<64x32xf32>
    %12 = arith.subf %11, %0 : vector<64x32xf32>
    %13 = arith.mulf %1, %12 : vector<64x32xf32>
    %14 = arith.truncf %13 : vector<64x32xf32> to vector<64x32xbf16>
    %c0_4 = arith.constant 0 : index
    %c0_5 = arith.constant 0 : index
    %15 = vector.load %arg3[%c0_4, %c0_5] : memref<1x32xf32, #tpu.memory_space<vmem>>, vector<1x32xf32>
    %16 = arith.truncf %15 : vector<1x32xf32> to vector<1x32xbf16>
    %cst_6 = arith.constant dense<0.000000e+00> : vector<1x64xf32>
    %17 = tpu.matmul %16, %14, %cst_6 {dimension_numbers = #tpu.dot_dimension_numbers<[1], [1], [0], [0], [0, 0, 1, 0], [], []>} : vector<1x32xbf16>, vector<64x32xbf16>, vector<1x64xf32> -> vector<1x64xf32>
    %c0_7 = arith.constant 0 : index
    %c0_8 = arith.constant 0 : index
    %18 = vector.load %arg4[%c0_7, %c0_8] : memref<1x64xf32, #tpu.memory_space<vmem>>, vector<1x64xf32>
    tpu.vector_store %arg4[%c0_7, %c0_8], %17 {strides = array<i32>} : memref<1x64xf32, #tpu.memory_space<vmem>>, vector<1x64xf32>,
    return
  }
  func.func @transform_0(%arg0: i32) -> (i32, i32) {
    %c0_i32 = arith.constant 0 : i32
    %c0_i32_0 = arith.constant 0 : i32
    return %arg0, %c0_i32 : i32, i32
  }
  func.func @transform_1(%arg0: i32) -> (i32, i32) {
    %c0_i32 = arith.constant 0 : i32
    %c0_i32_0 = arith.constant 0 : i32
    return %arg0, %c0_i32 : i32, i32
  }
  func.func @transform_2(%arg0: i32) -> (i32, i32) {
    %c0_i32 = arith.constant 0 : i32
    %c0_i32_0 = arith.constant 0 : i32
    %c0_i32_1 = arith.constant 0 : i32
    return %c0_i32, %c0_i32_0 : i32, i32
  }
  func.func @transform_3(%arg0: i32) -> (i32, i32) {
    %c0_i32 = arith.constant 0 : i32
    %c0_i32_0 = arith.constant 0 : i32
    return %arg0, %c0_i32 : i32, i32
  }
}

</mosaic_0001>

<bundles_post_ra>
// kernel: soft_cross_entropy_loss.1
= control target key start
LH: loop header
LB: loop body
LE: loop exit
PB: predicated region body
PF: predicated region fallthrough
CT: control target
= control target key end

     0   :  { %vm31_vm0 = vcmask 261120   ;;  %v263_v56 = vmov 0.0   ;;  %vm264_vm1 = vmmov 0   ;;  %vm205_vm2 = vcmask 516096   ;;  %s437_s0 = inlined_call_operand.vmem [shape: f32[64,32], index: 0, kind: input, shape index: {}]   ;;  %s438_s1 = inlined_call_operand.vmem [shape: f32[64,32], index: 1, kind: input, shape index: {}]   ;;  %s439_s2 = inlined_call_operand.vmem [shape: f32[1,32], index: 2, kind: input, shape index: {}]   ;;  %s440_s3 = inlined_call_operand.vmem [shape: f32[1,64], index: 3, kind: output, shape index: {}]  }
   0x1   :  { %v288_v0 = vld [vmem:[%s437_s0 + $0x30] sm:$0xff]  ;;  %v293_v1 = vld [vmem:[%s437_s0 + $0x38] sm:$0xff]  ;;  %v298_v2 = vld [vmem:[%s437_s0 + $0x20] sm:$0xff]  ;;  %217 = vmatprep.subr.bf16.mxu0 %v263_v56  ;;  %225 = vmatprep.mubr.msk.bf16.mxu0 %vm264_vm1, %v263_v56 }
   0x2   :  { %v50_v3 = vsel %vm31_vm0, %v288_v0, -inf  ;;  %v44_v4 = vsel %vm31_vm0, %v298_v2, -inf  ;;  %v307_v5 = vld [vmem:[%s437_s0 + $0x28] sm:$0xff]  ;;  %v53_v6 = vsel %vm31_vm0, %v293_v1, -inf  ;;  %v316_v8 = vld [vmem:[%s437_s0 + $0x10] sm:$0xff]  ;;  %v321_v9 = vld [vmem:[%s437_s0 + $0x18] sm:$0xff] }
   0x3   :  { %51 = vmax.xlane.f32.xlu0 %v50_v3  ;;  %45 = vmax.xlane.f32.xlu1 %v44_v4  ;;  %v47_v7 = vsel %vm31_vm0, %v307_v5, -inf  ;;  %v38_v10 = vsel %vm31_vm0, %v316_v8, -inf  ;;  %v41_v11 = vsel %vm31_vm0, %v321_v9, -inf  ;;  %v330_v12 = vld [vmem:[%s437_s0] sm:$0xff]  ;;  %v335_v13 = vld [vmem:[%s437_s0 + $0x8] sm:$0xff] }
   0x4   :  { %v32_v14 = vsel %vm31_vm0, %v330_v12, -inf  ;;  %v35_v15 = vsel %vm31_vm0, %v335_v13, -inf }
   0x7   :  { %54 = vmax.xlane.f32.xlu0 %v53_v6  ;;  %48 = vmax.xlane.f32.xlu1 %v47_v7 }
   0xb   :  { %39 = vmax.xlane.f32.xlu0 %v38_v10  ;;  %42 = vmax.xlane.f32.xlu1 %v41_v11 }
   0xf   :  { %33 = vmax.xlane.f32.xlu0 %v32_v14  ;;  %36 = vmax.xlane.f32.xlu1 %v35_v15 }
  0x8c   :  { %v341_v16 = vpop.xlane.xlu0 %51  ;;  %v343_v17 = vpop.xlane.xlu1 %45 }
  0x8d   :  { %v62_v18 = vsub.f32 %v288_v0, %v341_v16  ;;  %v60_v19 = vsub.f32 %v298_v2, %v343_v17 }
  0x8f   :  { %v76_v20 = vmul.f32 1.442695, %v62_v18  ;;  %v72_v21 = vmul.f32 1.442695, %v60_v19 }
  0x90   :  { %v349_v22 = vpop.xlane.xlu0 %54  ;;  %v351_v23 = vpop.xlane.xlu1 %48 }
  0x91   :  { %231 = vpow2.f32 %v76_v20  ;;  %v63_v24 = vsub.f32 %v293_v1, %v349_v22  ;;  %v61_v25 = vsub.f32 %v307_v5, %v351_v23 }
  0x92   :  { %233 = vpow2.f32 %v72_v21  ;;  %v29_v21 = vld [vmem:[%s438_s1 + $0x30] sm:$0xff] }
  0x93   :  { %v78_v26 = vmul.f32 1.442695, %v63_v24  ;;  %v74_v27 = vmul.f32 1.442695, %v61_v25  ;;  %v30_v24 = vld [vmem:[%s438_s1 + $0x38] sm:$0xff] }
  0x94   :  { %v357_v28 = vpop.xlane.xlu0 %39  ;;  %v359_v29 = vpop.xlane.xlu1 %42 }
  0x95   :  { %235 = vpow2.f32 %v78_v26  ;;  %v58_v30 = vsub.f32 %v316_v8, %v357_v28  ;;  %v59_v31 = vsub.f32 %v321_v9, %v359_v29 }
  0x96   :  { %237 = vpow2.f32 %v74_v27 }
  0x97   :  { %v68_v32 = vmul.f32 1.442695, %v58_v30  ;;  %v70_v33 = vmul.f32 1.442695, %v59_v31 }
  0x98   :  { %v365_v34 = vpop.xlane.xlu0 %33  ;;  %v367_v35 = vpop.xlane.xlu1 %36 }
  0x99   :  { %239 = vpow2.f32 %v68_v32  ;;  %v56_v36 = vsub.f32 %v330_v12, %v365_v34  ;;  %v57_v37 = vsub.f32 %v335_v13, %v367_v35 }
  0x9a   :  { %241 = vpow2.f32 %v70_v33  ;;  %v28_v33 = vld [vmem:[%s438_s1 + $0x28] sm:$0xff] }
  0x9b   :  { %v64_v38 = vmul.f32 1.442695, %v56_v36  ;;  %v66_v39 = vmul.f32 1.442695, %v57_v37 }
  0x9d   :  { %243 = vpow2.f32 %v64_v38 }
  0x9e   :  { %v232_v40 = vpop.eup %231  ;;  %245 = vpow2.f32 %v66_v39 }
  0x9f   :  { %v234_v41 = vpop.eup %233  ;;  %v98_v42 = vsel %vm31_vm0, %v232_v40, 0.0 }
  0xa0   :  { %99 = vadd.xlane.f32.xlu0 %v98_v42  ;;  %v92_v43 = vsel %vm31_vm0, %v234_v41, 0.0 }
  0xa2   :  { %v236_v44 = vpop.eup %235 }
  0xa3   :  { %v238_v45 = vpop.eup %237  ;;  %v101_v46 = vsel %vm31_vm0, %v236_v44, 0.0 }
  0xa4   :  { %102 = vadd.xlane.f32.xlu1 %v101_v46  ;;  %93 = vadd.xlane.f32.xlu0 %v92_v43  ;;  %v95_v47 = vsel %vm31_vm0, %v238_v45, 0.0  ;;  %v26_v46 = vld [vmem:[%s438_s1 + $0x18] sm:$0xff] }
  0xa6   :  { %v240_v48 = vpop.eup %239 }
  0xa7   :  { %v242_v49 = vpop.eup %241  ;;  %v86_v50 = vsel %vm31_vm0, %v240_v48, 0.0  ;;  %v25_v48 = vld [vmem:[%s438_s1 + $0x10] sm:$0xff] }
  0xa8   :  { %96 = vadd.xlane.f32.xlu1 %v95_v47  ;;  %87 = vadd.xlane.f32.xlu0 %v86_v50  ;;  %v89_v51 = vsel %vm31_vm0, %v242_v49, 0.0 }
  0xaa   :  { %v244_v52 = vpop.eup %243 }
  0xab   :  { %v246_v53 = vpop.eup %245  ;;  %v80_v54 = vsel %vm31_vm0, %v244_v52, 0.0 }
  0xac   :  { %90 = vadd.xlane.f32.xlu1 %v89_v51  ;;  %81 = vadd.xlane.f32.xlu0 %v80_v54  ;;  %v83_v55 = vsel %vm31_vm0, %v246_v53, 0.0 }
  0xb0   :  { %84 = vadd.xlane.f32.xlu1 %v83_v55 }
 0x129   :  { %v100_v57 = vpop.xlane.xlu0 %99 }
 0x12a   :  { %247 = vlog2.f32 %v100_v57 }
 0x12d   :  { %v103_v58 = vpop.xlane.xlu1 %102  ;;  %v94_v59 = vpop.xlane.xlu0 %93 }
 0x12e   :  { %249 = vlog2.f32 %v103_v58 }
 0x12f   :  { %251 = vlog2.f32 %v94_v59  ;;  %v148_v59 = vld [vmem:[%s439_s2] sm:$0x1] }
 0x131   :  { %v97_v60 = vpop.xlane.xlu1 %96  ;;  %v88_v61 = vpop.xlane.xlu0 %87 }
 0x132   :  { %253 = vlog2.f32 %v97_v60 }
 0x133   :  { %255 = vlog2.f32 %v88_v61 }
 0x135   :  { %v91_v62 = vpop.xlane.xlu1 %90  ;;  %v82_v4 = vpop.xlane.xlu0 %81 }
 0x136   :  { %257 = vlog2.f32 %v91_v62 }
 0x137   :  { %v248_v63 = vpop.eup %247 }
 0x138   :  { %v117_v3 = vmul.f32 0.6931472, %v248_v63 }
 0x139   :  { %v85_v6 = vpop.xlane.xlu1 %84 }
 0x13a   :  { %v126_v7 = vadd.f32 %v117_v3, %v341_v16  ;;  %259 = vlog2.f32 %v85_v6 }
 0x13b   :  { %v250_v10 = vpop.eup %249  ;;  %261 = vlog2.f32 %v82_v4 }
 0x13c   :  { %v252_v11 = vpop.eup %251  ;;  %v119_v14 = vmul.f32 0.6931472, %v250_v10  ;;  %v134_v19 = vsub.f32 %v126_v7, %v288_v0 }
 0x13d   :  { %v113_v15 = vmul.f32 0.6931472, %v252_v11 }
 0x13e   :  { %v127_v18 = vadd.f32 %v119_v14, %v349_v22  ;;  %v142_v22 = vmul.f32 %v134_v19, %v29_v21 }
 0x13f   :  { %v254_v20 = vpop.eup %253  ;;  %v124_v25 = vadd.f32 %v113_v15, %v343_v17 }
 0x140   :  { %v256_v16 = vpop.eup %255  ;;  %v115_v26 = vmul.f32 0.6931472, %v254_v20  ;;  %v135_v27 = vsub.f32 %v127_v18, %v293_v1  ;;  %v27_v1 = vld [vmem:[%s438_s1 + $0x20] sm:$0xff] }
 0x141   :  { %v109_v32 = vmul.f32 0.6931472, %v256_v16  ;;  %v132_v38 = vsub.f32 %v124_v25, %v298_v2 }
 0x142   :  { %v125_v30 = vadd.f32 %v115_v26, %v351_v23  ;;  %v143_v31 = vmul.f32 %v135_v27, %v30_v24 }
 0x143   :  { %v258_v0 = vpop.eup %257  ;;  %v122_v42 = vadd.f32 %v109_v32, %v357_v28  ;;  %v140_v43 = vmul.f32 %v132_v38, %v27_v1 }
 0x144   :  { %v111_v36 = vmul.f32 0.6931472, %v258_v0  ;;  %v147_v37 = vpack.c.bf16 %v143_v31, %v142_v22  ;;  %v133_v39 = vsub.f32 %v125_v30, %v307_v5 }
 0x145   :  { %v130_v47 = vsub.f32 %v122_v42, %v316_v8  ;;  %v24_v8 = vld [vmem:[%s438_s1 + $0x8] sm:$0xff] }
 0x146   :  { %v123_v17 = vadd.f32 %v111_v36, %v359_v29  ;;  %v163_v23 = vsel %vm31_vm0, %v147_v37, 0  ;;  %v141_v40 = vmul.f32 %v133_v39, %v28_v33 }
 0x147   :  { %v260_v41 = vpop.eup %259  ;;  %218 = vmatpush3.bf16.xpose.msra.mxu0 %v163_v23 }
 0x148   :  { %219 = vmatprep.subr.bf16.mxu0 %v263_v56  ;;  %v262_v44 = vpop.eup %261  ;;  %v107_v2 = vmul.f32 0.6931472, %v260_v41  ;;  %v146_v45 = vpack.c.bf16 %v141_v40, %v140_v43  ;;  %v131_v5 = vsub.f32 %v123_v17, %v321_v9  ;;  %v138_v9 = vmul.f32 %v130_v47, %v25_v48 }
 0x149   :  { %v105_v29 = vmul.f32 0.6931472, %v262_v44 }
 0x14a   :  { %v121_v28 = vadd.f32 %v107_v2, %v367_v35  ;;  %v160_v49 = vsel %vm31_vm0, %v146_v45, 0  ;;  %v139_v50 = vmul.f32 %v131_v5, %v26_v46  ;;  %v23_v35 = vld [vmem:[%s438_s1] sm:$0xff] }
 0x14b   :  { %v120_v51 = vadd.f32 %v105_v29, %v365_v34 }
 0x14c   :  { %v129_v52 = vsub.f32 %v121_v28, %v335_v13  ;;  %v145_v53 = vpack.c.bf16 %v139_v50, %v138_v9 }
 0x14d   :  { %v128_v54 = vsub.f32 %v120_v51, %v330_v12  ;;  %v149_v12 = vpack.c.bf16 %v148_v59, %v148_v59 }
 0x14e   :  { %v157_v55 = vsel %vm31_vm0, %v145_v53, 0  ;;  %v137_v57 = vmul.f32 %v129_v52, %v24_v8 }
 0x14f   :  { %220 = vmatpush3.bf16.xpose.msra.mxu0 %v160_v49  ;;  %v136_v34 = vmul.f32 %v128_v54, %v23_v35 }
 0x150   :  { %221 = vmatprep.subr.bf16.mxu0 %v263_v56 }
 0x151   :  { %v144_v58 = vpack.c.bf16 %v137_v57, %v136_v34 }
 0x153   :  { %v154_v13 = vsel %vm31_vm0, %v144_v58, 0 }
 0x157   :  { %222 = vmatpush3.bf16.xpose.msra.mxu0 %v157_v55 }
 0x158   :  { %223 = vmatprep.subr.bf16.mxu0 %v263_v56 }
 0x15f   :  { %224 = vmatpush3.bf16.xpose.msra.mxu0 %v154_v13 }
 0x166   :  { %226 = vmatmul.mubr.msk.bf16.vlgmr.msra.gmra.mxu0 %vm31_vm0, %v149_v12 }
 0x226   :  { %v199_v60 = vpop.f32.mrf.mxu0 }
 0x227   :  { %206 = vst.msk [vmem:[%s440_s3] sm:$0x1] %vm205_vm2, %v199_v60 }
 0x228   :  { %v227_v61 = vpop.f32.mrf.mxu0 }
 0x22a   :  { %v202_v56 = vpop.f32.mrf.mxu0 }
 0x22c   :  { %v228_v62 = vpop.f32.mrf.mxu0 }

</bundles_post_ra>
